<compile_context>
chip_gen: v6e
topology: v6e:2x2x1
jax: 0.10.0
libtpu: 0.0.40
codegen_flags: <defaults>
</compile_context>

<pallas_src>
import functools

import jax
import jax.numpy as jnp
from jax.experimental import pallas as pl
from jax.experimental.pallas import tpu as pltpu


def _round_up(x, m):
    return (x + m - 1) // m * m


def _cdiv(a, b):
    return -(-a // b)


# -----------------------------------------------------------------------------
# Pallas kernel
# -----------------------------------------------------------------------------
def _neumf_kernel(n_fc, dm_pad, df_pad, wspecs, slab_ref, wpack_ref, out_ref):
    """slab_ref : [TB, F_slab]  rows = batch, cols = [u_mlp|u_mf|i_mlp|i_mf] (padded)
    wpack_ref  : [R, C]         packed weights/biases, 8-row-aligned entries
    out_ref    : [1, TB]        scores, batch on lanes (lane-dense store)
    wspecs     : static tuple of (row_off, rows, cols) for each packed entry in
                 order [W1u, W1i, b1, (Wk, bk)*, wf_mlp, wf_mf, bf]
    """
    def w(k):
        r0, rr, cc = wspecs[k]
        return wpack_ref[r0:r0 + rr, 0:cc]

    # Transpose once to batch-on-lanes: elementwise work is lane-dense, every
    # matmul gets full-width N = TB, and the score store is a [1, TB] row.
    xt = slab_ref[...].T                                  # [F_slab, TB]
    off = dm_pad + df_pad
    u_mlp = xt[0:dm_pad, :]
    u_mf = xt[dm_pad:off, :]
    i_mlp = xt[off:off + dm_pad, :]
    i_mf = xt[off + dm_pad:off + dm_pad + df_pad, :]

    # ---- MLP tower (Dropout == identity at inference) ------------------------
    # Layer 1 with the concat folded away: W1 @ [u;i] = W1u @ u + W1i @ i.
    h = jnp.maximum(
        jnp.dot(w(0), u_mlp, preferred_element_type=jnp.float32)
        + jnp.dot(w(1), i_mlp, preferred_element_type=jnp.float32)
        + w(2), 0.0)
    k = 3
    for _ in range(n_fc - 1):
        h = jnp.maximum(
            jnp.dot(w(k), h, preferred_element_type=jnp.float32) + w(k + 1), 0.0)
        k += 2

    # ---- GMF branch -----------------------------------------------------------
    mf = u_mf * i_mf                                      # [df_pad, TB]

    # ---- fusion Linear on concat([mlp, mf]): VPU mul + sublane reduce ---------
    score = (jnp.sum(h * w(k), axis=0, keepdims=True)
             + jnp.sum(mf * w(k + 1), axis=0, keepdims=True)
             + w(k + 2))                                  # [1, TB] lane-dense
    out_ref[...] = score.astype(out_ref.dtype)


# -----------------------------------------------------------------------------
# Parameter preparation (done once, outside the hot path)
# -----------------------------------------------------------------------------
def _pack_weights(mats):
    """Pack small 2D arrays into one [R, C] f32 slab with 8-row-aligned entries."""
    C = _round_up(max(int(m.shape[1]) for m in mats), 128)
    specs, r = [], 0
    for m in mats:
        specs.append((r, int(m.shape[0]), int(m.shape[1])))
        r += _round_up(int(m.shape[0]), 8)
    packed = jnp.zeros((_round_up(r, 8), C), jnp.float32)
    for m, (r0, rr, cc) in zip(mats, specs):
        packed = packed.at[r0:r0 + rr, :cc].set(m.astype(jnp.float32))
    return packed, tuple(specs)


def prepare_kernel_params(params, config):
    """Convert PyTorch-layout params into the kernel's merged/packed layout."""
    layers = config["layers"]
    dim_mlp, dim_mf = config["dim_mlp"], config["dim_mf"]
    assert layers[0] == 2 * dim_mlp, "layers[0] must equal 2 * dim_mlp"
    dm_pad = _round_up(dim_mlp, 8)   # 8-sublane alignment for in-kernel slices
    df_pad = _round_up(dim_mf, 8)

    def pad_cols(a, width):
        return jnp.pad(a, ((0, 0), (0, width - a.shape[1])))

    # Merged tables: one gather per side instead of two.
    user_table = jnp.concatenate(
        [pad_cols(params["user_embed_mlp"], dm_pad),
         pad_cols(params["user_embed_mf"], df_pad)], axis=-1)
    item_table = jnp.concatenate(
        [pad_cols(params["item_embed_mlp"], dm_pad),
         pad_cols(params["item_embed_mf"], df_pad)], axis=-1)

    mats = []
    w1 = params["fc_w"][0].T                         # [out1, 2*dim_mlp]
    mats.append(pad_cols(w1[:, :dim_mlp], dm_pad))   # W1u
    mats.append(pad_cols(w1[:, dim_mlp:], dm_pad))   # W1i
    mats.append(params["fc_b"][0].T)                 # b1  [out1, 1]
    for w, b in zip(params["fc_w"][1:], params["fc_b"][1:]):
        mats.append(w.T)                             # [out, in]
        mats.append(b.T)                             # [out, 1]
    wf = params["final_w"]                           # [layers[-1] + dim_mf, 1]
    mats.append(wf[:layers[-1]])                     # wf_mlp
    mats.append(jnp.pad(wf[layers[-1]:], ((0, df_pad - dim_mf), (0, 0))))  # wf_mf
    mats.append(params["final_b"])                   # bf [1, 1]

    wpack, wspecs = _pack_weights(mats)
    return dict(user_table=user_table, item_table=item_table,
                wpack=wpack, wspecs=wspecs,
                dm_pad=dm_pad, df_pad=df_pad, n_fc=len(layers) - 1)


# -----------------------------------------------------------------------------
# Batch tiling
# -----------------------------------------------------------------------------
def _choose_tiling(B, tb_max, min_tiles):
    """Pick (TB, n_tiles, B_pad): TB multiple of 128, small worst-case padding,
    and >= min_tiles tiles whenever possible (feeds both v7x TensorCores)."""
    b128 = _round_up(B, 128)
    n = max(_cdiv(b128, tb_max), min_tiles if b128 >= 2 * 128 else 1)
    n = max(min(n, b128 // 128), 1)
    TB = _round_up(_cdiv(b128, n), 128)
    n_tiles = _cdiv(b128, TB)
    return TB, n_tiles, n_tiles * TB


# -----------------------------------------------------------------------------
# Python wrapper
# -----------------------------------------------------------------------------
def neural_mf_forward(user, item, kparams, *, tb_max=8192, min_tiles=2):
    """user, item: int32 index vectors of shape [B].  Returns [B, 1] float32."""
    dm_pad, df_pad, n_fc = kparams["dm_pad"], kparams["df_pad"], kparams["n_fc"]
    f_slab = 2 * (dm_pad + df_pad)
    wpack = kparams["wpack"]

    B = user.shape[0]
    TB, n_tiles, B_pad = _choose_tiling(B, tb_max, min_tiles)
    if B_pad != B:
        user = jnp.pad(user, (0, B_pad - B))   # index 0 is a valid row
        item = jnp.pad(item, (0, B_pad - B))

    # XLA glue: two row gathers + one concat, no transpose pass over activations.
    slab = jnp.concatenate(
        [jnp.take(kparams["user_table"], user, axis=0),
         jnp.take(kparams["item_table"], item, axis=0)], axis=-1)  # [B_pad, f_slab]

    out = pl.pallas_call(
        functools.partial(_neumf_kernel, n_fc, dm_pad, df_pad, kparams["wspecs"]),
        out_shape=jax.ShapeDtypeStruct((1, B_pad), jnp.float32),
        grid=(n_tiles,),
        in_specs=[
            pl.BlockSpec((TB, f_slab), lambda i: (i, 0)),      # streamed batch tile
            pl.BlockSpec(wpack.shape, lambda i: (0, 0)),       # VMEM-resident weights
        ],
        out_specs=pl.BlockSpec((1, TB), lambda i: (0, i)),
        compiler_params=pltpu.CompilerParams(
            dimension_semantics=("parallel",),
            vmem_limit_bytes=32 * 1024 * 1024),
    )(slab, wpack)

    return out[0, :B].reshape(B, 1)


# -----------------------------------------------------------------------------
# Deterministic parameter construction + pure-JAX reference
# -----------------------------------------------------------------------------
def init_params(key, config):
    layers = config["layers"]
    keys = jax.random.split(key, 16)
    p = {}
    p["user_embed_mf"] = 0.1 * jax.random.normal(
        keys[0], (config["num_users"], config["dim_mf"]), jnp.float32)
    p["item_embed_mf"] = 0.1 * jax.random.normal(
        keys[1], (config["num_items"], config["dim_mf"]), jnp.float32)
    p["user_embed_mlp"] = 0.1 * jax.random.normal(
        keys[2], (config["num_users"], config["dim_mlp"]), jnp.float32)
    p["item_embed_mlp"] = 0.1 * jax.random.normal(
        keys[3], (config["num_items"], config["dim_mlp"]), jnp.float32)

    fc_w, fc_b = [], []
    for idx, (din, dout) in enumerate(zip(layers[:-1], layers[1:])):
        fc_w.append(0.1 * jax.random.normal(keys[4 + idx], (din, dout), jnp.float32))
        fc_b.append(0.01 * jax.random.normal(keys[8 + idx], (1, dout), jnp.float32))
    p["fc_w"], p["fc_b"] = fc_w, fc_b

    fin = layers[-1] + config["dim_mf"]
    p["final_w"] = 0.1 * jax.random.normal(keys[12], (fin, 1), jnp.float32)
    p["final_b"] = 0.01 * jax.random.normal(keys[13], (1, 1), jnp.float32)
    return p


def reference_forward(user, item, params, config):
    u_mlp = jnp.take(params["user_embed_mlp"], user, axis=0)
    i_mlp = jnp.take(params["item_embed_mlp"], item, axis=0)
    u_mf = jnp.take(params["user_embed_mf"], user, axis=0)
    i_mf = jnp.take(params["item_embed_mf"], item, axis=0)
    h = jnp.concatenate([u_mlp, i_mlp], axis=-1)
    for w, b in zip(params["fc_w"], params["fc_b"]):
        h = jnp.maximum(h @ w + b, 0.0)
    mf = u_mf * i_mf
    return jnp.concatenate([h, mf], axis=-1) @ params["final_w"] + params["final_b"]


# -----------------------------------------------------------------------------
if __name__ == "__main__":
    config = {
        "num_users": 100,
        "num_items": 200,
        "dim_mf": 8,
        "dim_mlp": 8,
        "layers": [16, 32, 16, 8],   # layers[0] == 2 * dim_mlp
        "drop_out": 0.1,             # identity at inference
    }

    key = jax.random.PRNGKey(0)
    pkey, ukey, ikey = jax.random.split(key, 3)
    params = init_params(pkey, config)
    kparams = prepare_kernel_params(params, config)

    # B=8: single tile.  B=300: exercises the multi-tile (megacore) + padding path.
    for B in (8, 300):
        ukey, su = jax.random.split(ukey)
        ikey, si = jax.random.split(ikey)
        user = jax.random.randint(su, (B,), 0, config["num_users"], jnp.int32)
        item = jax.random.randint(si, (B,), 0, config["num_items"], jnp.int32)

        out = jax.block_until_ready(neural_mf_forward(user, item, kparams))
        ref = reference_forward(user, item, params, config)
        assert out.shape == (B, 1)
        assert jnp.allclose(out, ref, atol=1e-5, rtol=1e-5), (B, out[:4], ref[:4])

    print("KERNEL_OK")
</pallas_src>

<mosaic_0001>
module attributes {stable_mosaic.version = 11 : i64} {
  func.func @_neumf_kernel(%arg0: i32, %arg1: memref<128x32xf32, #tpu.memory_space<vmem>>, %arg2: memref<168x128xf32, #tpu.memory_space<vmem>>, %arg3: memref<1x128xf32, #tpu.memory_space<vmem>>) attributes {dimension_semantics = [#tpu.dimension_semantics<parallel>], iteration_bounds = array<i64: 1>, scalar_prefetch = 0 : i64, scratch_operands = 0 : i64, tpu.core_type = #tpu.core_type<tc>, window_params = [{transform_indices = @transform_0, window_bounds = array<i64: 128, 32>}, {pipeline_mode = #tpu.pipeline_mode<synchronous>, transform_indices = @transform_1, window_bounds = array<i64: 168, 128>}, {transform_indices = @transform_2, window_bounds = array<i64: 1, 128>}]} {
    %c0 = arith.constant 0 : index
    %c0_0 = arith.constant 0 : index
    %0 = vector.load %arg1[%c0, %c0_0] : memref<128x32xf32, #tpu.memory_space<vmem>>, vector<128x32xf32>
    %1 = tpu.transpose %0, [1, 0] : vector<128x32xf32> -> vector<32x128xf32>
    %2 = vector.extract_strided_slice %1 {offsets = [0, 0], sizes = [8, 128], strides = [1, 1]} : vector<32x128xf32> to vector<8x128xf32>
    %3 = vector.extract_strided_slice %1 {offsets = [8, 0], sizes = [8, 128], strides = [1, 1]} : vector<32x128xf32> to vector<8x128xf32>
    %4 = vector.extract_strided_slice %1 {offsets = [16, 0], sizes = [8, 128], strides = [1, 1]} : vector<32x128xf32> to vector<8x128xf32>
    %5 = vector.extract_strided_slice %1 {offsets = [24, 0], sizes = [8, 128], strides = [1, 1]} : vector<32x128xf32> to vector<8x128xf32>
    %c0_1 = arith.constant 0 : index
    %c0_2 = arith.constant 0 : index
    %6 = vector.load %arg2[%c0_1, %c0_2] : memref<168x128xf32, #tpu.memory_space<vmem>>, vector<32x8xf32>
    %cst = arith.constant dense<0.000000e+00> : vector<32x128xf32>
    %7 = tpu.matmul %6, %2, %cst {dimension_numbers = #tpu.dot_dimension_numbers<[1], [0], [0], [1], [0, 0, 1, 1], [], []>} : vector<32x8xf32>, vector<8x128xf32>, vector<32x128xf32> -> vector<32x128xf32>
    %c32 = arith.constant 32 : index
    %c0_3 = arith.constant 0 : index
    %8 = vector.load %arg2[%c32, %c0_3] : memref<168x128xf32, #tpu.memory_space<vmem>>, vector<32x8xf32>
    %cst_4 = arith.constant dense<0.000000e+00> : vector<32x128xf32>
    %9 = tpu.matmul %8, %4, %cst_4 {dimension_numbers = #tpu.dot_dimension_numbers<[1], [0], [0], [1], [0, 0, 1, 1], [], []>} : vector<32x8xf32>, vector<8x128xf32>, vector<32x128xf32> -> vector<32x128xf32>
    %10 = arith.addf %7, %9 : vector<32x128xf32>
    %c64 = arith.constant 64 : index
    %c0_5 = arith.constant 0 : index
    %11 = vector.load %arg2[%c64, %c0_5] : memref<168x128xf32, #tpu.memory_space<vmem>>, vector<32x1xf32>
    %12 = vector.broadcast %11 : vector<32x1xf32> to vector<32x128xf32>
    %13 = arith.addf %10, %12 : vector<32x128xf32>
    %cst_6 = arith.constant 0.000000e+00 : f32
    %14 = vector.broadcast %cst_6 : f32 to vector<32x128xf32>
    %15 = arith.maximumf %13, %14 : vector<32x128xf32>
    %c96 = arith.constant 96 : index
    %c0_7 = arith.constant 0 : index
    %16 = vector.load %arg2[%c96, %c0_7] : memref<168x128xf32, #tpu.memory_space<vmem>>, vector<16x32xf32>
    %cst_8 = arith.constant dense<0.000000e+00> : vector<16x128xf32>
    %17 = tpu.matmul %16, %15, %cst_8 {dimension_numbers = #tpu.dot_dimension_numbers<[1], [0], [0], [1], [0, 0, 1, 1], [], []>} : vector<16x32xf32>, vector<32x128xf32>, vector<16x128xf32> -> vector<16x128xf32>
    %c112 = arith.constant 112 : index
    %c0_9 = arith.constant 0 : index
    %18 = vector.load %arg2[%c112, %c0_9] : memref<168x128xf32, #tpu.memory_space<vmem>>, vector<16x1xf32>
    %19 = vector.broadcast %18 : vector<16x1xf32> to vector<16x128xf32>
    %20 = arith.addf %17, %19 : vector<16x128xf32>
    %cst_10 = arith.constant 0.000000e+00 : f32
    %21 = vector.broadcast %cst_10 : f32 to vector<16x128xf32>
    %22 = arith.maximumf %20, %21 : vector<16x128xf32>
    %c128 = arith.constant 128 : index
    %c0_11 = arith.constant 0 : index
    %23 = vector.load %arg2[%c128, %c0_11] : memref<168x128xf32, #tpu.memory_space<vmem>>, vector<8x16xf32>
    %cst_12 = arith.constant dense<0.000000e+00> : vector<8x128xf32>
    %24 = tpu.matmul %23, %22, %cst_12 {dimension_numbers = #tpu.dot_dimension_numbers<[1], [0], [0], [1], [0, 0, 1, 1], [], []>} : vector<8x16xf32>, vector<16x128xf32>, vector<8x128xf32> -> vector<8x128xf32>
    %c136 = arith.constant 136 : index
    %c0_13 = arith.constant 0 : index
    %25 = vector.load %arg2[%c136, %c0_13] : memref<168x128xf32, #tpu.memory_space<vmem>>, vector<8x1xf32>
    %26 = vector.broadcast %25 : vector<8x1xf32> to vector<8x128xf32>
    %27 = arith.addf %24, %26 : vector<8x128xf32>
    %cst_14 = arith.constant 0.000000e+00 : f32
    %28 = vector.broadcast %cst_14 : f32 to vector<8x128xf32>
    %29 = arith.maximumf %27, %28 : vector<8x128xf32>
    %30 = arith.mulf %3, %5 : vector<8x128xf32>
    %c144 = arith.constant 144 : index
    %c0_15 = arith.constant 0 : index
    %31 = vector.load %arg2[%c144, %c0_15] : memref<168x128xf32, #tpu.memory_space<vmem>>, vector<8x1xf32>
    %32 = vector.broadcast %31 : vector<8x1xf32> to vector<8x128xf32>
    %33 = arith.mulf %29, %32 : vector<8x128xf32>
    %cst_16 = arith.constant dense<0.000000e+00> : vector<128xf32>
    %34 = vector.multi_reduction <add>, %33, %cst_16 [0] : vector<8x128xf32> to vector<128xf32>
    %35 = vector.shape_cast %34 : vector<128xf32> to vector<1x128xf32>
    %c152 = arith.constant 152 : index
    %c0_17 = arith.constant 0 : index
    %36 = vector.load %arg2[%c152, %c0_17] : memref<168x128xf32, #tpu.memory_space<vmem>>, vector<8x1xf32>
    %37 = vector.broadcast %36 : vector<8x1xf32> to vector<8x128xf32>
    %38 = arith.mulf %30, %37 : vector<8x128xf32>
    %cst_18 = arith.constant dense<0.000000e+00> : vector<128xf32>
    %39 = vector.multi_reduction <add>, %38, %cst_18 [0] : vector<8x128xf32> to vector<128xf32>
    %40 = vector.shape_cast %39 : vector<128xf32> to vector<1x128xf32>
    %41 = arith.addf %35, %40 : vector<1x128xf32>
    %c160 = arith.constant 160 : index
    %c0_19 = arith.constant 0 : index
    %42 = vector.load %arg2[%c160, %c0_19] : memref<168x128xf32, #tpu.memory_space<vmem>>, vector<1x1xf32>
    %43 = vector.broadcast %42 : vector<1x1xf32> to vector<1x128xf32>
    %44 = arith.addf %41, %43 : vector<1x128xf32>
    %c0_20 = arith.constant 0 : index
    %c0_21 = arith.constant 0 : index
    %45 = vector.load %arg3[%c0_20, %c0_21] : memref<1x128xf32, #tpu.memory_space<vmem>>, vector<1x128xf32>
    tpu.vector_store %arg3[%c0_20, %c0_21], %44 {strides = array<i32>} : memref<1x128xf32, #tpu.memory_space<vmem>>, vector<1x128xf32>,
    return
  }
  func.func @transform_0(%arg0: i32) -> (i32, i32) {
    %c0_i32 = arith.constant 0 : i32
    %c0_i32_0 = arith.constant 0 : i32
    return %arg0, %c0_i32 : i32, i32
  }
  func.func @transform_1(%arg0: i32) -> (i32, i32) {
    %c0_i32 = arith.constant 0 : i32
    %c0_i32_0 = arith.constant 0 : i32
    %c0_i32_1 = arith.constant 0 : i32
    return %c0_i32, %c0_i32_0 : i32, i32
  }
  func.func @transform_2(%arg0: i32) -> (i32, i32) {
    %c0_i32 = arith.constant 0 : i32
    %c0_i32_0 = arith.constant 0 : i32
    return %c0_i32, %arg0 : i32, i32
  }
}

</mosaic_0001>

<bundles_post_ra>
// kernel: tpu_custom_call.1
= control target key start
LH: loop header
LB: loop body
LE: loop exit
PB: predicated region body
PF: predicated region fallthrough
CT: control target
= control target key end

     0   :  { %7 = vsyncpa [#allocation3], 0  ;;  %s746_s0 = inlined_call_operand.vmem [shape: f32[128,32], index: 0, kind: input, shape index: {}]   ;;  %s747_s1 = inlined_call_operand.hbm [shape: f32[168,128], index: 1, kind: input, shape index: {}]   ;;  %s748_s2 = inlined_call_operand.hbm [shape: f32[1,128], index: 2, kind: output, shape index: {}]  }
   0x1   :  { %8 = vsyncpa [#allocation4], 0  ;;  %s657_s9 = smov [#allocation2]  }
   0x2   :  { %s16_s10 = sshll.u32 %s657_s9, 4  ;;  %s17_s10 = int_to_ptr.vmem [resolvable:$true] %s16_s10 }
   0x3   :  { %s621_s11 = scalar_lea.vmem %s17_s10, 2688  ;;  %p626_p1 = scmp.lt.s32.totalorder %s17_s10, %s17_s10 }
   0x4   :  { %p622_p0 = scmp.ne.s32.totalorder %s17_s10, %s621_s11  ;;  %p627_p2 = scmp.lt.s32.totalorder %s621_s11, %s621_s11 }
   0x6   :  { %p628_p3 = por %p627_p2, %p626_p1 }
   0x8   :  { %p629_p4 = pnand %p628_p3, %p622_p0 }
   0xa   :  { %632 = shalt.err (!%p629_p4)
}
   0xb   :  { %s658_s12 = smov 128   ;;  %s659_s13 = smov 8  }
   0xc   :  { %22 = dma.hbm_to_vmem [thread:$0]  %s747_s1, 2688, %s17_s10, [#allocation3], %s658_s12, %s658_s12, %s659_s13  }
   0xd   :  { %653 = dma.done.wait [#allocation3], 2688  }
   0xe   :  { %654 = vsyncadd [#allocation3], 4294964608  ;;  %v660_v0 = vmov 0   ;;  %v280_v1 = vld [vmem:[#allocation2 + $0x58] sm:$0xff]  ;;  %v26_v2 = vld [vmem:[%s746_s0] sm:$0xff]  ;;  %vm82_vm0 = vcmask 64512  }
   0xf   :  { %611 = vset.pattern.permute.xlu1 %v660_v0  ;;  %42 = vxpose.xlu0.b32.start [1/16] (narrow) %v26_v2, 32  ;;  %v279_v3 = vld [vmem:[#allocation2 + $0x50] sm:$0xff]  ;;  %v27_v4 = vld [vmem:[%s746_s0 + $0x8] sm:$0xff]  ;;  %v74_v7 = vld [vmem:[#allocation2] sm:$0xff]  ;;  %vm323_vm1 = vcmask 261120   ;;  %vm662_vm2 = vmmov 0  }
  0x10   :  { %298 = vperm.xlu1 %611, %v280_v1   ;;  %v278_v5 = vld [vmem:[#allocation2 + $0x48] sm:$0xff]  ;;  %v28_v6 = vld [vmem:[%s746_s0 + $0x10] sm:$0xff]  ;;  %v78_v8 = vld [vmem:[#allocation2 + $0x20] sm:$0xff]  ;;  %580 = vmatprep.mubr.msk.f32.mxu1 %vm82_vm0, %v74_v7  ;;  %vm414_vm3 = vcmask 130048  }
  0x11   :  { %v277_v9 = vld [vmem:[#allocation2 + $0x40] sm:$0xff]  ;;  %v29_v10 = vld [vmem:[%s746_s0 + $0x18] sm:$0xff]  ;;  %572 = vmatprep.mubr.msk.f32.mxu0 %vm82_vm0, %v78_v8  ;;  %v311_v13 = vld [vmem:[#allocation2 + $0x70] sm:$0xff] }
  0x12   :  { %v312_v11 = vld [vmem:[#allocation2 + $0x78] sm:$0xff]  ;;  %v30_v12 = vld [vmem:[%s746_s0 + $0x20] sm:$0xff]  ;;  %v31_v14 = vld [vmem:[%s746_s0 + $0x28] sm:$0xff] }
  0x13   :  { %43 = vxpose.xlu0.b32.cont [2/16] (narrow) %v27_v4, 32  ;;  %v408_v15 = vld [vmem:[#allocation2 + $0x88] sm:$0xff]  ;;  %v32_v16 = vld [vmem:[%s746_s0 + $0x30] sm:$0xff]  ;;  %v33_v18 = vld [vmem:[%s746_s0 + $0x38] sm:$0xff] }
  0x14   :  { %293 = vperm.xlu1 %611, %v279_v3   ;;  %v490_v17 = vld [vmem:[#allocation2 + $0x90] sm:$0xff]  ;;  %v503_v19 = vld [vmem:[#allocation2 + $0x98] sm:$0xff]  ;;  %v34_v20 = vld [vmem:[%s746_s0 + $0x40] sm:$0xff] }
  0x15   :  { %v35_v21 = vld [vmem:[%s746_s0 + $0x48] sm:$0xff]  ;;  %v36_v22 = vld [vmem:[%s746_s0 + $0x50] sm:$0xff]  ;;  %v517_v23 = vld [vmem:[#allocation2 + $0xa0] sm:$0x1] }
  0x16   :  { %v37_v24 = vld [vmem:[%s746_s0 + $0x58] sm:$0xff]  ;;  %v38_v25 = vld [vmem:[%s746_s0 + $0x60] sm:$0xff]  ;;  %v39_v26 = vld [vmem:[%s746_s0 + $0x68] sm:$0xff] }
  0x17   :  { %44 = vxpose.xlu0.b32.cont [3/16] (narrow) %v28_v6, 32  ;;  %v40_v27 = vld [vmem:[%s746_s0 + $0x70] sm:$0xff]  ;;  %v41_v28 = vld [vmem:[%s746_s0 + $0x78] sm:$0xff]  ;;  %v75_v30 = vld [vmem:[#allocation2 + $0x8] sm:$0xff]  ;;  %s663_s0 = smov [#allocation5]  }
  0x18   :  { %288 = vperm.xlu1 %611, %v278_v5   ;;  %v76_v31 = vld [vmem:[#allocation2 + $0x10] sm:$0xff]  ;;  %v77_v33 = vld [vmem:[#allocation2 + $0x18] sm:$0xff]  ;;  %v79_v35 = vld [vmem:[#allocation2 + $0x28] sm:$0xff]  ;;  %s531_s19 = sshll.u32 %s663_s0, 4  ;;  %s532_s19 = int_to_ptr.vmem [resolvable:$true] %s531_s19 }
  0x19   :  { %v80_v36 = vld [vmem:[#allocation2 + $0x30] sm:$0xff]  ;;  %v81_v37 = vld [vmem:[#allocation2 + $0x38] sm:$0xff]  ;;  %v309_v38 = vld [vmem:[#allocation2 + $0x60] sm:$0xff]  ;;  %s633_s1 = scalar_lea.vmem %s532_s19, 16  ;;  %s637_s20 = scalar_lea.vmem %s532_s19, 32 }
  0x1a   :  { %v310_v63 = vld [vmem:[#allocation2 + $0x68] sm:$0xff]  ;;  %p634_p5 = scmp.ne.s32.totalorder %s532_s19, %s633_s1  ;;  %p638_p6 = scmp.lt.s32.totalorder %s532_s19, %s532_s19 }
  0x1b   :  { %45 = vxpose.xlu0.b32.cont [4/16] (narrow) %v29_v10, 32  ;;  %p639_p7 = scmp.lt.s32.totalorder %s637_s20, %s633_s1 }
  0x1c   :  { %283 = vperm.xlu1 %611, %v277_v9   ;;  %v407_v9 = vld [vmem:[#allocation2 + $0x80] sm:$0xff] }
  0x1d   :  { %p640_p8 = por %p639_p7, %p638_p6 }
  0x1f   :  { %46 = vxpose.xlu0.b32.cont [5/16] (narrow) %v30_v12, 32  ;;  %p641_p9 = pnand %p640_p8, %p634_p5 }
  0x20   :  { %320 = vperm.xlu1 %611, %v312_v11  }
  0x23   :  { %47 = vxpose.xlu0.b32.cont [6/16] (narrow) %v31_v14, 32 }
  0x24   :  { %315 = vperm.xlu1 %611, %v311_v13  }
  0x27   :  { %48 = vxpose.xlu0.b32.cont [7/16] (narrow) %v32_v16, 32 }
  0x28   :  { %411 = vperm.xlu1 %611, %v408_v15  }
  0x2b   :  { %49 = vxpose.xlu0.b32.cont [8/16] (narrow) %v33_v18, 32 }
  0x2c   :  { %493 = vperm.xlu1 %611, %v490_v17  }
  0x2f   :  { %50 = vxpose.xlu0.b32.cont [9/16] (narrow) %v34_v20, 32 }
  0x30   :  { %506 = vperm.xlu1 %611, %v503_v19  }
  0x33   :  { %51 = vxpose.xlu0.b32.cont [10/16] (narrow) %v35_v21, 32 }
  0x34   :  { %520 = vperm.xlu1 %611, %v517_v23  }
  0x37   :  { %52 = vxpose.xlu0.b32.cont [11/16] (narrow) %v36_v22, 32 }
  0x3b   :  { %53 = vxpose.xlu0.b32.cont [12/16] (narrow) %v37_v24, 32 }
  0x3f   :  { %54 = vxpose.xlu0.b32.cont [13/16] (narrow) %v38_v25, 32 }
  0x43   :  { %55 = vxpose.xlu0.b32.cont [14/16] (narrow) %v39_v26, 32 }
  0x47   :  { %56 = vxpose.xlu0.b32.cont [15/16] (narrow) %v40_v27, 32 }
  0x4b   :  { %57 = vxpose.xlu0.b32.end [16/16] (narrow) %v41_v28, 32 }
  0x74   :  { %612 = vset.pattern.permute.xlu0 %v660_v0  ;;  %v661_v0 = vmov 0.0  }
  0x8b   :  { %v58_v29 = vpop.trf.xlu0  ;;  %v299_v39 = vpop.permute.xlu1 %298 }
  0x8c   :  { %578 = vmatprep.subr.mxu1 %v58_v29 }
  0x8d   :  { %579 = vmatpush3.msra.mxu1 %v58_v29 }
  0x8e   :  { %581 = vmatmul.mubr.msk.f32.vlgmr.msra.gmra.mxu1 %vm82_vm0, %v75_v30  ;;  %597 = vmatprep.subr.mxu1 %v661_v0 }
  0x8f   :  { %v733_v32 = vpop.trf.xlu0  ;;  %583 = vmatprep.mubr.msk.f32.mxu1 %vm82_vm0, %v76_v31  ;;  %v294_v41 = vpop.permute.xlu1 %293 }
  0x92   :  { %584 = vmatmul.mubr.msk.f32.gmra.mxu1 %vm82_vm0, %v77_v33 }
  0x93   :  { %v60_v34 = vpop.trf.xlu0  ;;  %v289_v46 = vpop.permute.xlu1 %288  ;;  %601 = vmatprep.mubr.msk.f32.mxu1 %vm662_vm2, %v661_v0 }
  0x94   :  { %570 = vmatprep.subr.mxu0 %v60_v34 }
  0x95   :  { %571 = vmatpush3.msra.mxu0 %v60_v34 }
  0x96   :  { %573 = vmatmul.mubr.msk.f32.vlgmr.msra.gmra.mxu0 %vm82_vm0, %v79_v35 }
  0x97   :  { %575 = vmatprep.mubr.msk.f32.mxu0 %vm82_vm0, %v80_v36  ;;  %v284_v58 = vpop.permute.xlu1 %283  ;;  %v61_v12 = vpop.trf.xlu0 }
  0x98   :  { %v489_v14 = vmul.f32 %v61_v12, %v733_v32 }
  0x9a   :  { %576 = vmatmul.mubr.msk.f32.gmra.mxu0 %vm82_vm0, %v81_v37 }
  0x9b   :  { %594 = vmatprep.mubr.msk.f32.mxu0 %vm323_vm1, %v309_v38  ;;  %v321_v1 = vpop.permute.xlu1 %320 }
  0x9f   :  { %v316_v4 = vpop.permute.xlu1 %315 }
  0xa3   :  { %v412_v10 = vpop.permute.xlu1 %411 }
  0xa7   :  { %v494_v11 = vpop.permute.xlu1 %493 }
  0xab   :  { %v507_v13 = vpop.permute.xlu1 %506 }
  0xac   :  { %v509_v15 = vmul.f32 %v507_v13, %v489_v14 }
  0xae   :  { %v510_v16 = vrot.slane %v509_v15, 4 }
  0xaf   :  { %v521_v34 = vpop.permute.xlu1 %520 }
  0xb0   :  { %v511_v18 = vadd.f32 %v510_v16, %v509_v15 }
  0xb2   :  { %v512_v22 = vrot.slane %v511_v18, 2 }
  0xb4   :  { %v513_v25 = vadd.f32 %v512_v22, %v511_v18 }
  0xb6   :  { %v514_v28 = vrot.slane %v513_v25, 1 }
  0xb8   :  { %v515_v31 = vadd.f32 %v514_v28, %v513_v25 }
 0x14e   :  { %v582_v40 = vpop.f32.mrf.mxu1 }
 0x150   :  { %v258_v42 = vpop.f32.mrf.mxu1 }
 0x152   :  { %v585_v45 = vpop.f32.mrf.mxu1 }
 0x154   :  { %v268_v50 = vpop.f32.mrf.mxu1 }
 0x156   :  { %v574_v43 = vpop.f32.mrf.mxu0 }
 0x157   :  { %v264_v48 = vadd.f32 %v582_v40, %v574_v43 }
 0x158   :  { %v161_v44 = vpop.f32.mrf.mxu0 }
 0x159   :  { %v259_v52 = vadd.f32 %v258_v42, %v161_v44  ;;  %v302_v55 = vadd.f32 %v289_v46, %v264_v48 }
 0x15a   :  { %v577_v47 = vpop.f32.mrf.mxu0 }
 0x15b   :  { %v274_v49 = vadd.f32 %v585_v45, %v577_v47  ;;  %v301_v59 = vadd.f32 %v284_v58, %v259_v52  ;;  %v306_v61 = vmax.f32 %v302_v55, 0.0 }
 0x15c   :  { %v171_v51 = vpop.f32.mrf.mxu0 }
 0x15d   :  { %v304_v53 = vadd.f32 %v299_v39, %v274_v49  ;;  %v269_v54 = vadd.f32 %v268_v50, %v171_v51  ;;  %v305_v62 = vmax.f32 %v301_v59, 0.0 }
 0x15f   :  { %v308_v56 = vmax.f32 %v304_v53, 0.0  ;;  %v303_v57 = vadd.f32 %v294_v41, %v269_v54 }
 0x161   :  { %v307_v60 = vmax.f32 %v303_v57, 0.0  ;;  %586 = vmatprep.subr.mxu0 %v308_v56 }
 0x162   :  { %587 = vmatpush3.msra.mxu0 %v308_v56 }
 0x163   :  { %588 = vmatprep.subr.mxu0 %v307_v60 }
 0x164   :  { %589 = vmatpush3.msra.mxu0 %v307_v60 }
 0x165   :  { %590 = vmatprep.subr.mxu0 %v306_v61 }
 0x166   :  { %591 = vmatpush3.msra.mxu0 %v306_v61 }
 0x167   :  { %592 = vmatprep.subr.mxu0 %v305_v62 }
 0x168   :  { %593 = vmatpush3.msra.mxu0 %v305_v62 }
 0x169   :  { %595 = vmatmul.mubr.msk.f32.vlgmr.msra.gmra.mxu0 %vm323_vm1, %v310_v63 }
 0x229   :  { %v596_v2 = vpop.f32.mrf.mxu0 }
 0x22a   :  { %v402_v3 = vadd.f32 %v596_v2, %v321_v1 }
 0x22b   :  { %v396_v5 = vpop.f32.mrf.mxu0 }
 0x22c   :  { %v406_v6 = vmax.f32 %v402_v3, 0.0  ;;  %v397_v7 = vadd.f32 %v396_v5, %v316_v4 }
 0x22e   :  { %v405_v8 = vmax.f32 %v397_v7, 0.0  ;;  %598 = vmatpush3.msra.mxu1 %v406_v6 }
 0x22f   :  { %599 = vmatprep.subr.mxu1 %v661_v0 }
 0x230   :  { %600 = vmatpush3.msra.mxu1 %v405_v8 }
 0x231   :  { %602 = vmatmul.mubr.msk.f32.vlgmr.msra.gmra.mxu1 %vm414_vm3, %v407_v9 }
 0x2f1   :  { %v484_v17 = vpop.f32.mrf.mxu1 }
 0x2f2   :  { %v485_v19 = vadd.f32 %v484_v17, %v412_v10 }
 0x2f3   :  { %v603_v20 = vpop.f32.mrf.mxu1 }
 0x2f4   :  { %v488_v21 = vmax.f32 %v485_v19, 0.0 }
 0x2f6   :  { %v496_v23 = vmul.f32 %v494_v11, %v488_v21 }
 0x2f8   :  { %v497_v24 = vrot.slane %v496_v23, 4 }
 0x2fa   :  { %v498_v26 = vadd.f32 %v497_v24, %v496_v23 }
 0x2fc   :  { %v499_v27 = vrot.slane %v498_v26, 2 }
 0x2fe   :  { %v500_v29 = vadd.f32 %v499_v27, %v498_v26 }
 0x300   :  { %v501_v30 = vrot.slane %v500_v29, 1 }
 0x302   :  { %v502_v33 = vadd.f32 %v501_v30, %v500_v29 }
 0x304   :  { %v516_v32 = vadd.f32 %v515_v31, %v502_v33 }
 0x306   :  { %v523_v35 = vadd.f32 %v521_v34, %v516_v32 }
 0x308   :  { %524 = vst [vmem:[#allocation5] sm:$0x1] %v523_v35 }
 0x309   :  { %644 = shalt.err (!%p641_p9)
}
 0x30a   :  { %534 = dma.vmem_to_hbm [thread:$0]  %s532_s19, 16, %s748_s2, [#allocation4]  }
 0x30b   :  { %655 = dma.done.wait [#allocation4], 16  }
 0x30c   :  { %656 = vsyncadd [#allocation4], 4294967280 }
 0x30d   :  { %538 = vsyncpa [#allocation3], 1 }
 0x30e   :  { %539 = vsyncpa [#allocation4], 1 }

</bundles_post_ra>
